<compile_context>
chip_gen: v5e
topology: v5e:2x2
jax: 0.10.0
libtpu: 0.0.40
codegen_flags: <defaults>
</compile_context>

<pallas_src>
import jax
import jax.numpy as jnp
from jax.experimental import pallas as pl
from jax.experimental.pallas import tpu as pltpu

STATE_DIM = 3      # Pendulum observation: (cos th, sin th, thdot)
ACTION_DIM = 11
H1, H2, H3 = 256, 256, 128

PAD_IN = 8         # input features padded 3 -> 8 (zero columns/rows)
PAD_OUT = 128      # output padded 11 -> 128 for lane-dense stores
TB_MAX = 256       # max batch-tile rows per grid step


def qnetwork_kernel(x_ref,
                    w1_ref, b1_ref,
                    w2_ref, b2_ref,
                    w3_ref, b3_ref,
                    w4_ref, b4_ref,
                    out_ref):
    # Fully fused MLP on one (TB, PAD_IN) batch tile. All matmuls run on the MXU with
    # bf16 operands and f32 accumulation; biases / ReLU are done in f32 on the VPU.
    x = x_ref[...]                                                     # bf16 (TB, 8)

    h = jnp.dot(x, w1_ref[...], preferred_element_type=jnp.float32) + b1_ref[...]
    h = jnp.maximum(h, 0.0).astype(jnp.bfloat16)

    h = jnp.dot(h, w2_ref[...], preferred_element_type=jnp.float32) + b2_ref[...]
    h = jnp.maximum(h, 0.0).astype(jnp.bfloat16)

    h = jnp.dot(h, w3_ref[...], preferred_element_type=jnp.float32) + b3_ref[...]
    h = jnp.maximum(h, 0.0).astype(jnp.bfloat16)

    y = jnp.dot(h, w4_ref[...], preferred_element_type=jnp.float32) + b4_ref[...]
    out_ref[...] = y.astype(out_ref.dtype)                             # (TB, 128)


def _round_up(n, m):
    return ((n + m - 1) // m) * m


def qnetwork_forward(x, params):
    """x: (B, STATE_DIM) float32. params: dict of f32 (in,out) weights and (1,out) biases."""
    B = x.shape[0]

    # ---- batch padding / tile size ------------------------------------------------
    b8 = _round_up(B, 8)
    TB = min(TB_MAX, b8)
    B_pad = _round_up(b8, TB)

    # ---- prepare operands (pad + cast); zero-padding preserves the math ------------
    x_p = jnp.zeros((B_pad, PAD_IN), jnp.bfloat16)
    x_p = x_p.at[:B, :STATE_DIM].set(x.astype(jnp.bfloat16))

    w1 = jnp.zeros((PAD_IN, H1), jnp.bfloat16).at[:STATE_DIM, :].set(
        params["w1"].astype(jnp.bfloat16))
    w2 = params["w2"].astype(jnp.bfloat16)
    w3 = params["w3"].astype(jnp.bfloat16)
    w4 = jnp.zeros((H3, PAD_OUT), jnp.bfloat16).at[:, :ACTION_DIM].set(
        params["w4"].astype(jnp.bfloat16))

    b1 = params["b1"].astype(jnp.float32)
    b2 = params["b2"].astype(jnp.float32)
    b3 = params["b3"].astype(jnp.float32)
    b4 = jnp.zeros((1, PAD_OUT), jnp.float32).at[:, :ACTION_DIM].set(
        params["b4"].astype(jnp.float32))

    # ---- specs ----------------------------------------------------------------------
    # Weights/biases: full-array blocks with a constant index_map -> resident in VMEM.
    const = lambda a: pl.BlockSpec(a.shape, lambda i: (0,) * a.ndim)

    grid = (B_pad // TB,)

    out = pl.pallas_call(
        qnetwork_kernel,
        out_shape=jax.ShapeDtypeStruct((B_pad, PAD_OUT), jnp.float32),
        grid=grid,
        in_specs=[
            pl.BlockSpec((TB, PAD_IN), lambda i: (i, 0)),   # x: tiled over batch
            const(w1), const(b1),
            const(w2), const(b2),
            const(w3), const(b3),
            const(w4), const(b4),
        ],
        out_specs=pl.BlockSpec((TB, PAD_OUT), lambda i: (i, 0)),
        compiler_params=pltpu.CompilerParams(
            dimension_semantics=("parallel",)),             # megacore sharding on v7x
    )(x_p, w1, b1, w2, b2, w3, b3, w4, b4)

    return out[:B, :ACTION_DIM]


def init_params(key):
    """Deterministic init mimicking PyTorch nn.Linear default (uniform ±1/sqrt(fan_in))."""
    dims = [(STATE_DIM, H1), (H1, H2), (H2, H3), (H3, ACTION_DIM)]
    params = {}
    keys = jax.random.split(key, 2 * len(dims))
    for i, (fan_in, fan_out) in enumerate(dims):
        bound = 1.0 / jnp.sqrt(jnp.float32(fan_in))
        w = jax.random.uniform(keys[2 * i], (fan_in, fan_out), jnp.float32,
                               minval=-bound, maxval=bound)
        b = jax.random.uniform(keys[2 * i + 1], (1, fan_out), jnp.float32,
                               minval=-bound, maxval=bound)
        params[f"w{i + 1}"] = w
        params[f"b{i + 1}"] = b
    return params


def reference_forward_f32(x, params):
    h = jnp.maximum(x @ params["w1"] + params["b1"], 0.0)
    h = jnp.maximum(h @ params["w2"] + params["b2"], 0.0)
    h = jnp.maximum(h @ params["w3"] + params["b3"], 0.0)
    return h @ params["w4"] + params["b4"]


def reference_forward_bf16(x, params):
    """Pure-JAX reference using the same bf16-operand / f32-accumulate recipe."""
    cast = lambda a: a.astype(jnp.bfloat16)
    h = x.astype(jnp.bfloat16)
    for i in (1, 2, 3):
        h = jnp.dot(h, cast(params[f"w{i}"]),
                    preferred_element_type=jnp.float32) + params[f"b{i}"]
        h = jnp.maximum(h, 0.0).astype(jnp.bfloat16)
    return jnp.dot(h, cast(params["w4"]),
                   preferred_element_type=jnp.float32) + params["b4"]


if __name__ == "__main__":
    key = jax.random.PRNGKey(0)
    pkey, xkey = jax.random.split(key)

    params = init_params(pkey)
    batch = 8
    x = jax.random.normal(xkey, (batch, STATE_DIM), jnp.float32)

    out = qnetwork_forward(x, params)
    out = jax.block_until_ready(out)
    assert out.shape == (batch, ACTION_DIM)

    # Tight check against a reference using the identical bf16/f32-acc recipe.
    ref_bf16 = reference_forward_bf16(x, params)
    assert jnp.allclose(out, ref_bf16, atol=1e-2, rtol=1e-2), \
        "mismatch vs bf16-matched reference"

    # Loose check against the full-f32 PyTorch-equivalent math.
    ref_f32 = reference_forward_f32(x, params)
    assert jnp.allclose(out, ref_f32, atol=5e-2, rtol=5e-2), \
        "mismatch vs f32 reference"

    print("KERNEL_OK")
</pallas_src>

<mosaic_0001>
module attributes {stable_mosaic.version = 11 : i64} {
  func.func @qnetwork_kernel(%arg0: i32, %arg1: memref<8x8xbf16, #tpu.memory_space<vmem>>, %arg2: memref<8x256xbf16, #tpu.memory_space<vmem>>, %arg3: memref<1x256xf32, #tpu.memory_space<vmem>>, %arg4: memref<256x256xbf16, #tpu.memory_space<vmem>>, %arg5: memref<1x256xf32, #tpu.memory_space<vmem>>, %arg6: memref<256x128xbf16, #tpu.memory_space<vmem>>, %arg7: memref<1x128xf32, #tpu.memory_space<vmem>>, %arg8: memref<128x128xbf16, #tpu.memory_space<vmem>>, %arg9: memref<1x128xf32, #tpu.memory_space<vmem>>, %arg10: memref<8x128xf32, #tpu.memory_space<vmem>>) attributes {dimension_semantics = [#tpu.dimension_semantics<parallel>], iteration_bounds = array<i64: 1>, scalar_prefetch = 0 : i64, scratch_operands = 0 : i64, tpu.core_type = #tpu.core_type<tc>, window_params = [{transform_indices = @transform_0, window_bounds = array<i64: 8, 8>}, {pipeline_mode = #tpu.pipeline_mode<synchronous>, transform_indices = @transform_1, window_bounds = array<i64: 8, 256>}, {pipeline_mode = #tpu.pipeline_mode<synchronous>, transform_indices = @transform_2, window_bounds = array<i64: 1, 256>}, {pipeline_mode = #tpu.pipeline_mode<synchronous>, transform_indices = @transform_3, window_bounds = array<i64: 256, 256>}, {pipeline_mode = #tpu.pipeline_mode<synchronous>, transform_indices = @transform_4, window_bounds = array<i64: 1, 256>}, {pipeline_mode = #tpu.pipeline_mode<synchronous>, transform_indices = @transform_5, window_bounds = array<i64: 256, 128>}, {pipeline_mode = #tpu.pipeline_mode<synchronous>, transform_indices = @transform_6, window_bounds = array<i64: 1, 128>}, {pipeline_mode = #tpu.pipeline_mode<synchronous>, transform_indices = @transform_7, window_bounds = array<i64: 128, 128>}, {pipeline_mode = #tpu.pipeline_mode<synchronous>, transform_indices = @transform_8, window_bounds = array<i64: 1, 128>}, {transform_indices = @transform_9, window_bounds = array<i64: 8, 128>}]} {
    %c0 = arith.constant 0 : index
    %c0_0 = arith.constant 0 : index
    %0 = vector.load %arg1[%c0, %c0_0] : memref<8x8xbf16, #tpu.memory_space<vmem>>, vector<8x8xbf16>
    %c0_1 = arith.constant 0 : index
    %c0_2 = arith.constant 0 : index
    %1 = vector.load %arg2[%c0_1, %c0_2] : memref<8x256xbf16, #tpu.memory_space<vmem>>, vector<8x256xbf16>
    %cst = arith.constant dense<0.000000e+00> : vector<8x256xf32>
    %2 = tpu.matmul %0, %1, %cst {dimension_numbers = #tpu.dot_dimension_numbers<[1], [0], [0], [1], [0, 0, 1, 1], [], []>} : vector<8x8xbf16>, vector<8x256xbf16>, vector<8x256xf32> -> vector<8x256xf32>
    %c0_3 = arith.constant 0 : index
    %c0_4 = arith.constant 0 : index
    %3 = vector.load %arg3[%c0_3, %c0_4] : memref<1x256xf32, #tpu.memory_space<vmem>>, vector<1x256xf32>
    %4 = vector.broadcast %3 : vector<1x256xf32> to vector<8x256xf32>
    %5 = arith.addf %2, %4 : vector<8x256xf32>
    %cst_5 = arith.constant 0.000000e+00 : f32
    %6 = vector.broadcast %cst_5 : f32 to vector<8x256xf32>
    %7 = arith.maximumf %5, %6 : vector<8x256xf32>
    %8 = arith.truncf %7 : vector<8x256xf32> to vector<8x256xbf16>
    %c0_6 = arith.constant 0 : index
    %c0_7 = arith.constant 0 : index
    %9 = vector.load %arg4[%c0_6, %c0_7] : memref<256x256xbf16, #tpu.memory_space<vmem>>, vector<256x256xbf16>
    %cst_8 = arith.constant dense<0.000000e+00> : vector<8x256xf32>
    %10 = tpu.matmul %8, %9, %cst_8 {dimension_numbers = #tpu.dot_dimension_numbers<[1], [0], [0], [1], [0, 0, 1, 1], [], []>} : vector<8x256xbf16>, vector<256x256xbf16>, vector<8x256xf32> -> vector<8x256xf32>
    %c0_9 = arith.constant 0 : index
    %c0_10 = arith.constant 0 : index
    %11 = vector.load %arg5[%c0_9, %c0_10] : memref<1x256xf32, #tpu.memory_space<vmem>>, vector<1x256xf32>
    %12 = vector.broadcast %11 : vector<1x256xf32> to vector<8x256xf32>
    %13 = arith.addf %10, %12 : vector<8x256xf32>
    %cst_11 = arith.constant 0.000000e+00 : f32
    %14 = vector.broadcast %cst_11 : f32 to vector<8x256xf32>
    %15 = arith.maximumf %13, %14 : vector<8x256xf32>
    %16 = arith.truncf %15 : vector<8x256xf32> to vector<8x256xbf16>
    %c0_12 = arith.constant 0 : index
    %c0_13 = arith.constant 0 : index
    %17 = vector.load %arg6[%c0_12, %c0_13] : memref<256x128xbf16, #tpu.memory_space<vmem>>, vector<256x128xbf16>
    %cst_14 = arith.constant dense<0.000000e+00> : vector<8x128xf32>
    %18 = tpu.matmul %16, %17, %cst_14 {dimension_numbers = #tpu.dot_dimension_numbers<[1], [0], [0], [1], [0, 0, 1, 1], [], []>} : vector<8x256xbf16>, vector<256x128xbf16>, vector<8x128xf32> -> vector<8x128xf32>
    %c0_15 = arith.constant 0 : index
    %c0_16 = arith.constant 0 : index
    %19 = vector.load %arg7[%c0_15, %c0_16] : memref<1x128xf32, #tpu.memory_space<vmem>>, vector<1x128xf32>
    %20 = vector.broadcast %19 : vector<1x128xf32> to vector<8x128xf32>
    %21 = arith.addf %18, %20 : vector<8x128xf32>
    %cst_17 = arith.constant 0.000000e+00 : f32
    %22 = vector.broadcast %cst_17 : f32 to vector<8x128xf32>
    %23 = arith.maximumf %21, %22 : vector<8x128xf32>
    %24 = arith.truncf %23 : vector<8x128xf32> to vector<8x128xbf16>
    %c0_18 = arith.constant 0 : index
    %c0_19 = arith.constant 0 : index
    %25 = vector.load %arg8[%c0_18, %c0_19] : memref<128x128xbf16, #tpu.memory_space<vmem>>, vector<128x128xbf16>
    %cst_20 = arith.constant dense<0.000000e+00> : vector<8x128xf32>
    %26 = tpu.matmul %24, %25, %cst_20 {dimension_numbers = #tpu.dot_dimension_numbers<[1], [0], [0], [1], [0, 0, 1, 1], [], []>} : vector<8x128xbf16>, vector<128x128xbf16>, vector<8x128xf32> -> vector<8x128xf32>
    %c0_21 = arith.constant 0 : index
    %c0_22 = arith.constant 0 : index
    %27 = vector.load %arg9[%c0_21, %c0_22] : memref<1x128xf32, #tpu.memory_space<vmem>>, vector<1x128xf32>
    %28 = vector.broadcast %27 : vector<1x128xf32> to vector<8x128xf32>
    %29 = arith.addf %26, %28 : vector<8x128xf32>
    %c0_23 = arith.constant 0 : index
    %c0_24 = arith.constant 0 : index
    %30 = vector.load %arg10[%c0_23, %c0_24] : memref<8x128xf32, #tpu.memory_space<vmem>>, vector<8x128xf32>
    tpu.vector_store %arg10[%c0_23, %c0_24], %29 {strides = array<i32>} : memref<8x128xf32, #tpu.memory_space<vmem>>, vector<8x128xf32>,
    return
  }
  func.func @transform_0(%arg0: i32) -> (i32, i32) {
    %c0_i32 = arith.constant 0 : i32
    %c0_i32_0 = arith.constant 0 : i32
    return %arg0, %c0_i32 : i32, i32
  }
  func.func @transform_1(%arg0: i32) -> (i32, i32) {
    %c0_i32 = arith.constant 0 : i32
    %c0_i32_0 = arith.constant 0 : i32
    %c0_i32_1 = arith.constant 0 : i32
    return %c0_i32, %c0_i32_0 : i32, i32
  }
  func.func @transform_2(%arg0: i32) -> (i32, i32) {
    %c0_i32 = arith.constant 0 : i32
    %c0_i32_0 = arith.constant 0 : i32
    %c0_i32_1 = arith.constant 0 : i32
    return %c0_i32, %c0_i32_0 : i32, i32
  }
  func.func @transform_3(%arg0: i32) -> (i32, i32) {
    %c0_i32 = arith.constant 0 : i32
    %c0_i32_0 = arith.constant 0 : i32
    %c0_i32_1 = arith.constant 0 : i32
    return %c0_i32, %c0_i32_0 : i32, i32
  }
  func.func @transform_4(%arg0: i32) -> (i32, i32) {
    %c0_i32 = arith.constant 0 : i32
    %c0_i32_0 = arith.constant 0 : i32
    %c0_i32_1 = arith.constant 0 : i32
    return %c0_i32, %c0_i32_0 : i32, i32
  }
  func.func @transform_5(%arg0: i32) -> (i32, i32) {
    %c0_i32 = arith.constant 0 : i32
    %c0_i32_0 = arith.constant 0 : i32
    %c0_i32_1 = arith.constant 0 : i32
    return %c0_i32, %c0_i32_0 : i32, i32
  }
  func.func @transform_6(%arg0: i32) -> (i32, i32) {
    %c0_i32 = arith.constant 0 : i32
    %c0_i32_0 = arith.constant 0 : i32
    %c0_i32_1 = arith.constant 0 : i32
    return %c0_i32, %c0_i32_0 : i32, i32
  }
  func.func @transform_7(%arg0: i32) -> (i32, i32) {
    %c0_i32 = arith.constant 0 : i32
    %c0_i32_0 = arith.constant 0 : i32
    %c0_i32_1 = arith.constant 0 : i32
    return %c0_i32, %c0_i32_0 : i32, i32
  }
  func.func @transform_8(%arg0: i32) -> (i32, i32) {
    %c0_i32 = arith.constant 0 : i32
    %c0_i32_0 = arith.constant 0 : i32
    %c0_i32_1 = arith.constant 0 : i32
    return %c0_i32, %c0_i32_0 : i32, i32
  }
  func.func @transform_9(%arg0: i32) -> (i32, i32) {
    %c0_i32 = arith.constant 0 : i32
    %c0_i32_0 = arith.constant 0 : i32
    return %arg0, %c0_i32 : i32, i32
  }
}

</mosaic_0001>

<bundles_post_ra>
// kernel: tpu_custom_call.1
= control target key start
LH: loop header
LB: loop body
LE: loop exit
PB: predicated region body
PF: predicated region fallthrough
CT: control target
= control target key end

     0   :  { %14 = vsyncpa [#allocation3], 0  ;;  %s1260_s0 = inlined_call_operand.hbm [shape: bf16[8,8], index: 0, kind: input, shape index: {}]   ;;  %s1261_s1 = inlined_call_operand.hbm [shape: bf16[8,256], index: 1, kind: input, shape index: {}]   ;;  %s1262_s2 = inlined_call_operand.hbm [shape: f32[1,256], index: 2, kind: input, shape index: {}]   ;;  %s1263_s3 = inlined_call_operand.hbm [shape: bf16[256,256], index: 3, kind: input, shape index: {}]   ;;  %s1264_s4 = inlined_call_operand.vmem [shape: f32[1,256], index: 4, kind: input, shape index: {}]   ;;  %s1265_s5 = inlined_call_operand.hbm [shape: bf16[256,128], index: 5, kind: input, shape index: {}]   ;;  %s1266_s6 = inlined_call_operand.vmem [shape: f32[1,128], index: 6, kind: input, shape index: {}]   ;;  %s1267_s7 = inlined_call_operand.hbm [shape: bf16[128,128], index: 7, kind: input, shape index: {}]   ;;  %s1268_s8 = inlined_call_operand.vmem [shape: f32[1,128], index: 8, kind: input, shape index: {}]   ;;  %s1269_s9 = inlined_call_operand.hbm [shape: f32[8,128], index: 9, kind: output, shape index: {}]  }
   0x1   :  { %15 = vsyncpa [#allocation6], 0 }
   0x2   :  { %16 = vsyncpa [#allocation9], 0 }
   0x3   :  { %17 = vsyncpa [#allocation12], 0  ;;  %s35_s11 = sshll.u32 %s1261_s1, 4  ;;  %s36_s11 = int_to_ptr.hbm [resolvable:$true] %s35_s11 }
   0x4   :  { %18 = vsyncpa [#allocation4], 0  ;;  %s1165_s12 = smov [#allocation5]   ;;  %s56_s16 = sshll.u32 %s1263_s3, 4  ;;  %s57_s16 = int_to_ptr.hbm [resolvable:$true] %s56_s16 }
   0x5   :  { %s37_s13 = sshll.u32 %s1165_s12, 4  ;;  %s1166_s17 = smov [#allocation8]   ;;  %s38_s13 = int_to_ptr.vmem [resolvable:$true] %s37_s13 }
   0x6   :  { %40 = dma.hbm_to_vmem [thread:$0]  %s36_s11, 128, %s38_s13, [#allocation6]  }
   0x7   :  { %s58_s18 = sshll.u32 %s1166_s17, 4  ;;  %s1167_s19 = smov 128   ;;  %s59_s18 = int_to_ptr.vmem [resolvable:$true] %s58_s18 }
   0x8   :  { %s1168_s20 = smov 8   ;;  %s24_s1 = sshll.u32 %s1260_s0, 4  ;;  %s25_s1 = int_to_ptr.hbm [resolvable:$true] %s24_s1 }
   0x9   :  { %64 = dma.hbm_to_vmem [thread:$0]  %s57_s16, 4096, %s59_s18, [#allocation9], %s1167_s19, %s1167_s19, %s1168_s20  }
   0xa   :  { %s1169_s23 = smov [#allocation2]   ;;  %s46_s3 = sshll.u32 %s1262_s2, 4  ;;  %s47_s3 = int_to_ptr.hbm [resolvable:$true] %s46_s3 }
   0xb   :  { %s26_s24 = sshll.u32 %s1169_s23, 4  ;;  %s1170_s27 = smov [#allocation7]   ;;  %s27_s24 = int_to_ptr.vmem [resolvable:$true] %s26_s24 }
   0xc   :  { %29 = dma.hbm_to_vmem [thread:$0]  %s25_s1, 64, %s27_s24, [#allocation3]  }
   0xd   :  { %s48_s28 = sshll.u32 %s1170_s27, 4  ;;  %s71_s10 = sshll.u32 %s1265_s5, 4  ;;  %s49_s28 = int_to_ptr.vmem [resolvable:$true] %s48_s28  ;;  %s72_s10 = int_to_ptr.hbm [resolvable:$true] %s71_s10 }
   0xe   :  { %51 = dma.hbm_to_vmem [thread:$0]  %s47_s3, 32, %s49_s28, [#allocation6]  }
   0xf   :  { %s1171_s0 = smov [#allocation10]   ;;  %s86_s14 = sshll.u32 %s1267_s7, 4  ;;  %s87_s14 = int_to_ptr.hbm [resolvable:$true] %s86_s14 }
  0x10   :  { %s73_s11 = sshll.u32 %s1171_s0, 4  ;;  %s1172_s15 = smov 64   ;;  %s74_s11 = int_to_ptr.vmem [resolvable:$true] %s73_s11 }
  0x11   :  { %s1173_s2 = smov 4   ;;  %s1174_s16 = smov [#allocation11]  }
  0x12   :  { %79 = dma.hbm_to_vmem [thread:$0]  %s72_s10, 2048, %s74_s11, [#allocation9], %s1172_s15, %s1172_s15, %s1173_s2  }
  0x13   :  { %s88_s17 = sshll.u32 %s1174_s16, 4  ;;  %s89_s17 = int_to_ptr.vmem [resolvable:$true] %s88_s17 }
  0x14   :  { %94 = dma.hbm_to_vmem [thread:$0]  %s87_s14, 1024, %s89_s17, [#allocation12], %s1172_s15, %s1172_s15, %s1173_s2  }
  0x15   :  { %1155 = dma.done.wait [#allocation3], 64  }
  0x16   :  { %1156 = vsyncadd [#allocation3], 4294967232 }
  0x17   :  { %1157 = dma.done.wait [#allocation6], 160  }
  0x18   :  { %1158 = vsyncadd [#allocation6], 4294967136 }
  0x19   :  { %1159 = dma.done.wait [#allocation9], 6144  }
  0x1a   :  { %1160 = vsyncadd [#allocation9], 4294961152 }
  0x1b   :  { %1161 = dma.done.wait [#allocation12], 1024  }
  0x1c   :  { %1162 = vsyncadd [#allocation12], 4294966272  ;;  %v123_v0 = vld [vmem:[#allocation5] sm:$0xff]  ;;  %vm139_vm0 = vcmask 1043456   ;;  %v752_v1 = vld [vmem:[#allocation8 + $0x70] sm:$0xf] }
  0x1d   :  { %v131_v2 = vunpack.c.l.b16 %v123_v0  ;;  %v132_v3 = vunpack.c.h.b16 %v123_v0  ;;  %v933_v4 = vld [vmem:[#allocation8 + $0x74] sm:$0xf0]  ;;  %v932_v5 = vld [vmem:[#allocation8 + $0x74] sm:$0xf]  ;;  %v754_v6 = vld [vmem:[#allocation8 + $0x78] sm:$0xf0] }
  0x1e   :  { %v753_v7 = vor.u32 %v933_v4, %v752_v1  ;;  %v757_v8 = vor.u32 %v932_v5, %v754_v6  ;;  %v744_v9 = vld [vmem:[#allocation8 + $0x60] sm:$0xf]  ;;  %v931_v10 = vld [vmem:[#allocation8 + $0x64] sm:$0xf0]  ;;  %v930_v11 = vld [vmem:[#allocation8 + $0x64] sm:$0xf] }
  0x1f   :  { %v133_v12 = vpack.c.b16 %v131_v2, %v131_v2  ;;  %v134_v13 = vpack.c.b16 %v132_v3, %v132_v3  ;;  %v746_v14 = vld [vmem:[#allocation8 + $0x68] sm:$0xf0]  ;;  %v745_v15 = vor.u32 %v931_v10, %v744_v9  ;;  %v736_v17 = vld [vmem:[#allocation8 + $0x50] sm:$0xf]  ;;  %v929_v18 = vld [vmem:[#allocation8 + $0x54] sm:$0xf0] }
  0x20   :  { %374 = vmatpush.bf16.msra.mxu2 %v753_v7  ;;  %400 = vmatpush.bf16.msra.mxu0 %v757_v8  ;;  %v749_v16 = vor.u32 %v930_v11, %v746_v14  ;;  %v928_v21 = vld [vmem:[#allocation8 + $0x54] sm:$0xf]  ;;  %v738_v22 = vld [vmem:[#allocation8 + $0x58] sm:$0xf0]  ;;  %vm135_vm1 = vcmask 64512   ;;  %v737_v27 = vor.u32 %v929_v18, %v736_v17  ;;  %s1175_s21 = smov [#allocation13]  }
  0x21   :  { %v141_v19 = vsel %vm139_vm0, %v133_v12, 0  ;;  %v144_v20 = vsel %vm139_vm0, %v134_v13, 0  ;;  %v122_v23 = vld [vmem:[#allocation2] sm:$0xf]  ;;  %v728_v24 = vld [vmem:[#allocation8 + $0x40] sm:$0xf]  ;;  %v741_v28 = vor.u32 %v928_v21, %v738_v22 }
  0x22   :  { %153 = vmatpush.bf16.msra.mxu1 %v141_v19  ;;  %v816_v25 = vld [vmem:[#allocation8 + $0xf0] sm:$0xf]  ;;  %v949_v26 = vld [vmem:[#allocation8 + $0xf4] sm:$0xf0]  ;;  %v927_v29 = vld [vmem:[#allocation8 + $0x44] sm:$0xf0] }
  0x23   :  { %v817_v30 = vor.u32 %v949_v26, %v816_v25  ;;  %v948_v31 = vld [vmem:[#allocation8 + $0xf4] sm:$0xf]  ;;  %v818_v32 = vld [vmem:[#allocation8 + $0xf8] sm:$0xf0]  ;;  %v926_v33 = vld [vmem:[#allocation8 + $0x44] sm:$0xf]  ;;  %v729_v41 = vor.u32 %v927_v29, %v728_v24 }
  0x24   :  { %375 = vmatpush.bf16.msra.mxu2 %v745_v15  ;;  %401 = vmatpush.bf16.msra.mxu0 %v749_v16  ;;  %v730_v34 = vld [vmem:[#allocation8 + $0x48] sm:$0xf0]  ;;  %v821_v35 = vor.u32 %v948_v31, %v818_v32  ;;  %v808_v36 = vld [vmem:[#allocation8 + $0xe0] sm:$0xf]  ;;  %v947_v37 = vld [vmem:[#allocation8 + $0xe4] sm:$0xf0] }
  0x25   :  { %692 = vmatmul.msk.bf16.vlgmr.msra.gmra.mxu1 %vm135_vm1, %v122_v23  ;;  %387 = vmatpush.bf16.msra.mxu3 %v817_v30  ;;  %v809_v38 = vor.u32 %v947_v37, %v808_v36  ;;  %v946_v39 = vld [vmem:[#allocation8 + $0xe4] sm:$0xf]  ;;  %v810_v40 = vld [vmem:[#allocation8 + $0xe8] sm:$0xf0]  ;;  %v733_v42 = vor.u32 %v926_v33, %v730_v34  ;;  %v720_v43 = vld [vmem:[#allocation8 + $0x30] sm:$0xf] }
  0x26   :  { %166 = vmatpush.bf16.msrb.mxu1 %v144_v20  ;;  %v813_v44 = vor.u32 %v946_v39, %v810_v40  ;;  %v925_v45 = vld [vmem:[#allocation8 + $0x34] sm:$0xf0]  ;;  %v924_v46 = vld [vmem:[#allocation8 + $0x34] sm:$0xf]  ;;  %v722_v47 = vld [vmem:[#allocation8 + $0x38] sm:$0xf0] }
  0x27   :  { %v721_v48 = vor.u32 %v925_v45, %v720_v43  ;;  %v725_v49 = vor.u32 %v924_v46, %v722_v47  ;;  %v712_v50 = vld [vmem:[#allocation8 + $0x20] sm:$0xf]  ;;  %v923_v51 = vld [vmem:[#allocation8 + $0x24] sm:$0xf0]  ;;  %v922_v52 = vld [vmem:[#allocation8 + $0x24] sm:$0xf] }
  0x28   :  { %376 = vmatpush.bf16.msra.mxu2 %v737_v27  ;;  %402 = vmatpush.bf16.msra.mxu0 %v741_v28  ;;  %v714_v53 = vld [vmem:[#allocation8 + $0x28] sm:$0xf0]  ;;  %v713_v54 = vor.u32 %v923_v51, %v712_v50  ;;  %v704_v56 = vld [vmem:[#allocation8 + $0x10] sm:$0xf]  ;;  %v921_v57 = vld [vmem:[#allocation8 + $0x14] sm:$0xf0] }
  0x29   :  { %388 = vmatpush.bf16.msra.mxu3 %v809_v38  ;;  %v717_v55 = vor.u32 %v922_v52, %v714_v53  ;;  %v800_v58 = vld [vmem:[#allocation8 + $0xd0] sm:$0xf]  ;;  %v705_v59 = vor.u32 %v921_v57, %v704_v56  ;;  %v945_v60 = vld [vmem:[#allocation8 + $0xd4] sm:$0xf0]  ;;  %v920_v61 = vld [vmem:[#allocation8 + $0x14] sm:$0xf] }
  0x2a   :  { %413 = vmatpush.bf16.msra.mxu1 %v821_v35  ;;  %v706_v62 = vld [vmem:[#allocation8 + $0x18] sm:$0xf0]  ;;  %v801_v63 = vor.u32 %v945_v60, %v800_v58  ;;  %v944_v1 = vld [vmem:[#allocation8 + $0xd4] sm:$0xf]  ;;  %v696_v4 = vld [vmem:[#allocation8] sm:$0xf] }
  0x2b   :  { %v709_v0 = vor.u32 %v920_v61, %v706_v62  ;;  %v802_v2 = vld [vmem:[#allocation8 + $0xd8] sm:$0xf0]  ;;  %v919_v5 = vld [vmem:[#allocation8 + $0x4] sm:$0xf0]  ;;  %v792_v6 = vld [vmem:[#allocation8 + $0xc0] sm:$0xf] }
  0x2c   :  { %377 = vmatpush.bf16.msra.mxu2 %v729_v41  ;;  %403 = vmatpush.bf16.msra.mxu0 %v733_v42  ;;  %v805_v3 = vor.u32 %v944_v1, %v802_v2  ;;  %v697_v7 = vor.u32 %v919_v5, %v696_v4  ;;  %v943_v8 = vld [vmem:[#allocation8 + $0xc4] sm:$0xf0]  ;;  %v918_v9 = vld [vmem:[#allocation8 + $0x4] sm:$0xf]  ;;  %v698_v10 = vld [vmem:[#allocation8 + $0x8] sm:$0xf0] }
  0x2d   :  { %389 = vmatpush.bf16.msra.mxu3 %v801_v63  ;;  %v793_v11 = vor.u32 %v943_v8, %v792_v6  ;;  %v701_v12 = vor.u32 %v918_v9, %v698_v10  ;;  %v942_v13 = vld [vmem:[#allocation8 + $0xc4] sm:$0xf]  ;;  %v794_v14 = vld [vmem:[#allocation8 + $0xc8] sm:$0xf0]  ;;  %v784_v16 = vld [vmem:[#allocation8 + $0xb0] sm:$0xf] }
  0x2e   :  { %414 = vmatpush.bf16.msra.mxu1 %v813_v44  ;;  %v797_v15 = vor.u32 %v942_v13, %v794_v14  ;;  %v941_v17 = vld [vmem:[#allocation8 + $0xb4] sm:$0xf0]  ;;  %v940_v18 = vld [vmem:[#allocation8 + $0xb4] sm:$0xf]  ;;  %v786_v20 = vld [vmem:[#allocation8 + $0xb8] sm:$0xf0] }
  0x2f   :  { %v785_v19 = vor.u32 %v941_v17, %v784_v16  ;;  %v789_v21 = vor.u32 %v940_v18, %v786_v20  ;;  %v776_v22 = vld [vmem:[#allocation8 + $0xa0] sm:$0xf]  ;;  %v938_v24 = vld [vmem:[#allocation8 + $0xa4] sm:$0xf]  ;;  %v778_v26 = vld [vmem:[#allocation8 + $0xa8] sm:$0xf0] }
  0x30   :  { %378 = vmatpush.bf16.msra.mxu2 %v721_v48  ;;  %404 = vmatpush.bf16.msra.mxu0 %v725_v49  ;;  %v781_v27 = vor.u32 %v938_v24, %v778_v26  ;;  %v768_v28 = vld [vmem:[#allocation8 + $0x90] sm:$0xf]  ;;  %v937_v29 = vld [vmem:[#allocation8 + $0x94] sm:$0xf0]  ;;  %v936_v30 = vld [vmem:[#allocation8 + $0x94] sm:$0xf] }
  0x31   :  { %390 = vmatpush.bf16.msra.mxu3 %v793_v11  ;;  %v769_v31 = vor.u32 %v937_v29, %v768_v28  ;;  %v770_v32 = vld [vmem:[#allocation8 + $0x98] sm:$0xf0]  ;;  %v760_v34 = vld [vmem:[#allocation8 + $0x80] sm:$0xf]  ;;  %v935_v35 = vld [vmem:[#allocation8 + $0x84] sm:$0xf0] }
  0x32   :  { %415 = vmatpush.bf16.msra.mxu1 %v805_v3  ;;  %v773_v33 = vor.u32 %v936_v30, %v770_v32  ;;  %v934_v36 = vld [vmem:[#allocation8 + $0x84] sm:$0xf]  ;;  %v761_v37 = vor.u32 %v935_v35, %v760_v34  ;;  %v762_v38 = vld [vmem:[#allocation8 + $0x88] sm:$0xf0]  ;;  %v965_v40 = vld [vmem:[#allocation10 + $0x78] sm:$0xff]  ;;  %s677_s22 = sshll.u32 %s1175_s21, 4  ;;  %s678_s22 = int_to_ptr.vmem [resolvable:$true] %s677_s22 }
  0x33   :  { %v765_v39 = vor.u32 %v934_v36, %v762_v38  ;;  %v957_v41 = vld [vmem:[#allocation10 + $0x38] sm:$0xff]  ;;  %v964_v43 = vld [vmem:[#allocation10 + $0x70] sm:$0xff]  ;;  %v963_v56 = vld [vmem:[#allocation10 + $0x68] sm:$0xff]  ;;  %s679_s24 = sshll.u32 %s1269_s9, 4  ;;  %s680_s24 = int_to_ptr.hbm [resolvable:$true] %s679_s24 }
  0x34   :  { %379 = vmatpush.bf16.msra.mxu2 %v713_v54  ;;  %405 = vmatpush.bf16.msra.mxu0 %v717_v55  ;;  %v124_v42 = vld [vmem:[#allocation7] sm:$0x3]  ;;  %v956_v57 = vld [vmem:[#allocation10 + $0x30] sm:$0xff]  ;;  %v962_v58 = vld [vmem:[#allocation10 + $0x60] sm:$0xff] }
  0x35   :  { %693 = vmatmul.msk.bf16.vlgmr.msrb.gmra.mxu1 %vm135_vm1, %v122_v23  ;;  %v939_v23 = vld [vmem:[#allocation8 + $0xa4] sm:$0xf0]  ;;  %391 = vmatpush.bf16.msra.mxu3 %v785_v19  ;;  %v126_v44 = vperm.slane %v124_v42, 0  ;;  %v127_v50 = vperm.slane %v124_v42, 1  ;;  %v961_v60 = vld [vmem:[#allocation10 + $0x58] sm:$0xff]  ;;  %v954_v61 = vld [vmem:[#allocation10 + $0x20] sm:$0xff] }
  0x36   :  { %416 = vmatpush.bf16.msra.mxu1 %v797_v15  ;;  %v777_v25 = vor.u32 %v939_v23, %v776_v22  ;;  %v960_v62 = vld [vmem:[#allocation10 + $0x50] sm:$0xff]  ;;  %v953_v63 = vld [vmem:[#allocation10 + $0x18] sm:$0xff]  ;;  %v958_v2 = vld [vmem:[#allocation10 + $0x40] sm:$0xff] }
  0x37   :  { %v952_v1 = vld [vmem:[#allocation10 + $0x10] sm:$0xff]  ;;  %v951_v3 = vld [vmem:[#allocation10 + $0x8] sm:$0xff]  ;;  %v950_v4 = vld [vmem:[#allocation10] sm:$0xff] }
  0x38   :  { %380 = vmatpush.bf16.msra.mxu2 %v705_v59  ;;  %406 = vmatpush.bf16.msra.mxu0 %v709_v0  ;;  %v955_v59 = vld [vmem:[#allocation10 + $0x28] sm:$0xff]  ;;  %v973_v5 = vld [vmem:[#allocation11 + $0x38] sm:$0xff]  ;;  %v208_v10 = vld [vmem:[%s1264_s4] sm:$0x3] }
  0x39   :  { %392 = vmatpush.bf16.msra.mxu3 %v777_v25  ;;  %v959_v0 = vld [vmem:[#allocation10 + $0x48] sm:$0xff]  ;;  %v211_v13 = vperm.slane %v208_v10, 1  ;;  %v210_v17 = vperm.slane %v208_v10, 0  ;;  %v969_v28 = vld [vmem:[#allocation11 + $0x18] sm:$0xff]  ;;  %v968_v29 = vld [vmem:[#allocation11 + $0x10] sm:$0xff] }
  0x3a   :  { %417 = vmatpush.bf16.msra.mxu1 %v789_v21  ;;  %v971_v8 = vld [vmem:[#allocation11 + $0x28] sm:$0xff] }
  0x3b   :  { %v967_v30 = vld [vmem:[#allocation11 + $0x8] sm:$0xff] }
  0x3c   :  { %381 = vmatpush.bf16.msra.mxu2 %v697_v7  ;;  %407 = vmatpush.bf16.msra.mxu0 %v701_v12  ;;  %v972_v7 = vld [vmem:[#allocation11 + $0x30] sm:$0xff]  ;;  %v970_v12 = vld [vmem:[#allocation11 + $0x20] sm:$0xff] }
  0x3d   :  { %393 = vmatpush.bf16.msra.mxu3 %v769_v31  ;;  %v966_v31 = vld [vmem:[#allocation11] sm:$0xff] }
  0x3e   :  { %418 = vmatpush.bf16.msra.mxu1 %v781_v27 }
  0x40   :  { %562 = vmatpush.bf16.msrb.mxu2 %v957_v41  ;;  %658 = vmatpush.bf16.msrb.mxu0 %v973_v5  ;;  %v986_v41 = vld [vmem:[%s1268_s8] ss:$0 sm:$0xff] }
  0x41   :  { %394 = vmatpush.bf16.msra.mxu3 %v761_v37 }
  0x42   :  { %419 = vmatpush.bf16.msra.mxu1 %v773_v33  ;;  %v985_v33 = vld [vmem:[%s1266_s6] ss:$0 sm:$0xff] }
  0x44   :  { %563 = vmatpush.bf16.msrb.mxu2 %v956_v57  ;;  %659 = vmatpush.bf16.msrb.mxu0 %v972_v7 }
  0x45   :  { %575 = vmatpush.bf16.msrb.mxu3 %v965_v40 }
  0x46   :  { %420 = vmatpush.bf16.msra.mxu1 %v765_v39 }
  0x48   :  { %564 = vmatpush.bf16.msrb.mxu2 %v955_v59  ;;  %660 = vmatpush.bf16.msrb.mxu0 %v971_v8 }
  0x49   :  { %576 = vmatpush.bf16.msrb.mxu3 %v964_v43 }
  0x4c   :  { %565 = vmatpush.bf16.msrb.mxu2 %v954_v61  ;;  %661 = vmatpush.bf16.msrb.mxu0 %v970_v12 }
  0x4d   :  { %577 = vmatpush.bf16.msrb.mxu3 %v963_v56 }
  0x50   :  { %566 = vmatpush.bf16.msrb.mxu2 %v953_v63  ;;  %662 = vmatpush.bf16.msrb.mxu0 %v969_v28 }
  0x51   :  { %578 = vmatpush.bf16.msrb.mxu3 %v962_v58 }
  0x54   :  { %567 = vmatpush.bf16.msrb.mxu2 %v952_v1  ;;  %663 = vmatpush.bf16.msrb.mxu0 %v968_v29 }
  0x55   :  { %579 = vmatpush.bf16.msrb.mxu3 %v961_v60 }
  0x58   :  { %568 = vmatpush.bf16.msrb.mxu2 %v951_v3  ;;  %664 = vmatpush.bf16.msrb.mxu0 %v967_v30 }
  0x59   :  { %580 = vmatpush.bf16.msrb.mxu3 %v960_v62 }
  0x5c   :  { %569 = vmatpush.bf16.msrb.mxu2 %v950_v4  ;;  %665 = vmatpush.bf16.msrb.mxu0 %v966_v31 }
  0x5d   :  { %581 = vmatpush.bf16.msrb.mxu3 %v959_v0 }
  0x61   :  { %582 = vmatpush.bf16.msrb.mxu3 %v958_v2 }
  0xa2   :  { %v155_v45 = vpop.f32.mrf.mxu1 }
  0xa3   :  { %v156_v46 = vadd.f32 %v155_v45, %v126_v44 }
  0xa5   :  { %v172_v47 = vmax.f32 %v156_v46, 0.0 }
  0xa7   :  { %v174_v48 = vpack.c.bf16 %v172_v47, %v172_v47 }
  0xa9   :  { %382 = vmatmul.bf16.vlgmr.msra.gmra.mxu2 %v174_v48  ;;  %408 = vmatmul.bf16.vlgmr.msra.gmra.mxu0 %v174_v48 }
  0xaa   :  { %v157_v49 = vpop.f32.mrf.mxu1 }
  0xb2   :  { %v168_v51 = vpop.f32.mrf.mxu1 }
  0xb3   :  { %v169_v52 = vadd.f32 %v168_v51, %v127_v50 }
  0xb5   :  { %v173_v53 = vmax.f32 %v169_v52, 0.0 }
  0xb7   :  { %v175_v54 = vpack.c.bf16 %v173_v53, %v173_v53 }
  0xb9   :  { %395 = vmatmul.bf16.vlgmr.msra.gmra.mxu3 %v175_v54  ;;  %421 = vmatmul.bf16.vlgmr.msra.gmra.mxu1 %v175_v54 }
  0xba   :  { %v170_v55 = vpop.f32.mrf.mxu1 }
 0x126   :  { %v409_v6 = vpop.f32.mrf.mxu0 }
 0x127   :  { %v410_v15 = vadd.f32 %v409_v6, %v211_v13 }
 0x12c   :  { %v383_v9 = vpop.f32.mrf.mxu2 }
 0x12d   :  { %v384_v20 = vadd.f32 %v383_v9, %v210_v17 }
 0x12e   :  { %v411_v11 = vpop.f32.mrf.mxu0 }
 0x134   :  { %v385_v14 = vpop.f32.mrf.mxu2 }
 0x136   :  { %v422_v16 = vpop.f32.mrf.mxu1 }
 0x137   :  { %v423_v18 = vadd.f32 %v422_v16, %v410_v15 }
 0x139   :  { %v427_v19 = vmax.f32 %v423_v18, 0.0 }
 0x13b   :  { %v429_v21 = vpack.c.bf16 %v427_v19, %v427_v19 }
 0x13c   :  { %v396_v22 = vpop.f32.mrf.mxu3 }
 0x13d   :  { %v397_v23 = vadd.f32 %v396_v22, %v384_v20  ;;  %583 = vmatmul.bf16.vlgmr.msrb.gmra.mxu3 %v429_v21 }
 0x13e   :  { %v424_v24 = vpop.f32.mrf.mxu1 }
 0x13f   :  { %v426_v25 = vmax.f32 %v397_v23, 0.0 }
 0x141   :  { %v428_v26 = vpack.c.bf16 %v426_v25, %v426_v25 }
 0x143   :  { %570 = vmatmul.bf16.vlgmr.msrb.gmra.mxu2 %v428_v26 }
 0x144   :  { %v398_v27 = vpop.f32.mrf.mxu3 }
 0x1c0   :  { %v584_v32 = vpop.f32.mrf.mxu3 }
 0x1c6   :  { %v571_v34 = vpop.f32.mrf.mxu2 }
 0x1c7   :  { %v572_v35 = vadd.f32 %v985_v33, %v571_v34 }
 0x1c8   :  { %v586_v36 = vpop.f32.mrf.mxu3 }
 0x1c9   :  { %v585_v37 = vadd.f32 %v584_v32, %v572_v35 }
 0x1cb   :  { %v588_v38 = vmax.f32 %v585_v37, 0.0 }
 0x1cd   :  { %v589_v39 = vpack.c.bf16 %v588_v38, %v588_v38 }
 0x1ce   :  { %v573_v40 = vpop.f32.mrf.mxu2 }
 0x1cf   :  { %666 = vmatmul.bf16.vlgmr.msrb.gmra.mxu0 %v589_v39 }
 0x24c   :  { %v667_v42 = vpop.f32.mrf.mxu0 }
 0x24d   :  { %v668_v43 = vadd.f32 %v986_v41, %v667_v42 }
 0x24f   :  { %671 = vst [vmem:[#allocation13] sm:$0xff] %v668_v43 }
 0x250   :  { %682 = dma.vmem_to_hbm [thread:$0]  %s678_s22, 128, %s680_s24, [#allocation4]  }
 0x254   :  { %v669_v44 = vpop.f32.mrf.mxu0 }
 0x255   :  { %1163 = dma.done.wait [#allocation4], 128  }
 0x256   :  { %1164 = vsyncadd [#allocation4], 4294967168 }
 0x257   :  { %687 = vsyncpa [#allocation3], 1 }
 0x258   :  { %688 = vsyncpa [#allocation6], 1 }
 0x259   :  { %689 = vsyncpa [#allocation9], 1 }
 0x25a   :  { %690 = vsyncpa [#allocation12], 1 }
 0x25b   :  { %691 = vsyncpa [#allocation4], 1 }

</bundles_post_ra>
